<compile_context>
chip_gen: v5e
topology: v5e:2x2
jax: 0.10.0
libtpu: 0.0.40
codegen_flags: <defaults>
</compile_context>

<pallas_src>
import functools

import jax
import jax.numpy as jnp
import numpy as np
from jax.experimental import pallas as pl
from jax.experimental.pallas import tpu as pltpu


# ---------------------------------------------------------------------------
# Kernel A: pipelined max / sum reduction over W (lane-dense folded layout).
#   x2: (B, W, C*H)  ->  x_max, x_sum: (B, 1, C*H)
#   grid = (B, nCH, nW); W is the innermost ("arbitrary") accumulator axis.
# ---------------------------------------------------------------------------
def _reduce_kernel(x_ref, max_ref, sum_ref):
    wt = pl.program_id(2)
    xb = x_ref[...]                                  # (1, w_tile, ch_tile)
    blk_max = jnp.max(xb, axis=1, keepdims=True)     # (1, 1, ch_tile)
    blk_sum = jnp.sum(xb, axis=1, keepdims=True)

    @pl.when(wt == 0)
    def _():
        max_ref[...] = blk_max
        sum_ref[...] = blk_sum

    @pl.when(wt > 0)
    def _():
        max_ref[...] = jnp.maximum(max_ref[...], blk_max)
        sum_ref[...] = sum_ref[...] + blk_sum


# ---------------------------------------------------------------------------
# Kernel B: tiny gate finalize (runs once) in (B, C, H) layout (H on lanes).
#   conv1 (w0*max + w1*mean + bias) -> depthwise Conv1d along H as K shifted
#   taps on a zero-padded lane axis -> BatchNorm1d (training-mode stats over
#   (B, H) per channel) -> sigmoid.
# ---------------------------------------------------------------------------
def _gate_kernel(c1_ref, xmax_ref, xsum_ref, dw_ref, gamma_ref, beta_ref,
                 gate_ref, *, inv_w, K, pad):
    # Hoist SMEM scalars once.
    w0 = c1_ref[0]
    w1 = c1_ref[1]
    bias = c1_ref[2]

    x_max = xmax_ref[...]                    # (B, C, H)
    x_mean = xsum_ref[...] * inv_w
    z = w0 * x_max + w1 * x_mean + bias      # conv1: 1x1 conv over {max, mean}

    Bb, Cc, Hh = z.shape
    if pad > 0:
        zpad = jnp.zeros((Bb, Cc, pad), z.dtype)
        zp = jnp.concatenate([zpad, z, zpad], axis=2)   # (B, C, H + 2*pad)
    else:
        zp = z

    dw = dw_ref[...]                         # (C, K) depthwise taps
    z2 = jnp.zeros_like(z)
    for k in range(K):                       # O(K) shifted multiply-adds
        z2 = z2 + dw[:, k:k + 1][None] * zp[:, :, k:k + Hh]

    # BatchNorm1d(C): training-mode batch stats over (B, H) per channel.
    # (Exact only because the full B and H extents live in this single block.)
    mu = jnp.mean(jnp.mean(z2, axis=2, keepdims=True), axis=0, keepdims=True)
    d = z2 - mu
    var = jnp.mean(jnp.mean(d * d, axis=2, keepdims=True), axis=0, keepdims=True)
    zn = d * jax.lax.rsqrt(var + 1e-5)
    zn = zn * gamma_ref[...][None] + beta_ref[...][None]   # (C,1) -> (1,C,1)

    gate_ref[...] = jax.nn.sigmoid(zn)       # (B, C, H)


# ---------------------------------------------------------------------------
# Kernel C: streaming broadcast multiply out = x * gate (lane-dense, tiled,
# double-buffered by the BlockSpec pipeline, megacore-parallel grid).
# ---------------------------------------------------------------------------
def _mul_kernel(x_ref, g_ref, o_ref):
    o_ref[...] = (x_ref[...] * g_ref[...]).astype(o_ref.dtype)


# ---------------------------------------------------------------------------
# Tile / VMEM sizing helpers (generation-aware: v5e/v6e 128 MiB, v7x 64 MiB).
# ---------------------------------------------------------------------------
def _vmem_capacity_bytes():
    try:
        return int(pltpu.get_tpu_info().vmem_capacity_bytes)
    except Exception:
        return 64 << 20   # conservative fallback: v7x per-TensorCore VMEM


def _divisors(n):
    return [d for d in range(1, n + 1) if n % d == 0]


def _pick_tiles(W, CH, itemsize, budget):
    """Pick (w_tile, ch_tile) so each (1, w_tile, ch_tile) block stays under
    `budget` bytes, blocks stay legal w.r.t. the (8, 128) tiling constraint
    (multiples or full extents), and the lane dim stays dense (128-multiple)
    whenever CH % 128 == 0."""
    # --- CH (lane) tiling ---
    if 8 * CH * itemsize <= budget or CH % 128 != 0:
        # Full CH fits a minimal (8, CH) block, or CH can't be split into
        # lane-dense chunks (only legal option then is the full extent; may
        # need a raised vmem_limit for pathological shapes, still correct).
        ch_tile = CH
    else:
        ch_tile = 128
        n128 = CH // 128
        for d in _divisors(n128):
            c = 128 * d
            if 8 * c * itemsize <= budget:
                ch_tile = max(ch_tile, c)
    # --- W (sublane) tiling: multiples of 8 that divide W, or W itself ---
    w_cands = [w for w in sorted(_divisors(W), reverse=True)
               if w % 8 == 0 or w == W]          # always non-empty (W itself)
    w_tile = w_cands[-1]                         # smallest legal tile fallback
    for w in w_cands:
        if w * ch_tile * itemsize <= budget:
            w_tile = w
            break
    return w_tile, ch_tile


def attention_weight(x, conv1_w, conv1_b, conv2_w, gamma, beta, *, kernel_size=7):
    B, W, C, H = x.shape
    K = kernel_size
    pad = (K - 1) // 2
    CH = C * H
    fsize = jnp.dtype(jnp.float32).itemsize

    x2 = x.reshape(B, W, CH)                 # contiguous trailing merge (free)

    cap = _vmem_capacity_bytes()
    block_budget = min(4 << 20, cap // 16)   # ~4 MiB blocks; 85%+ of HBM roofline
    vmem_limit = int(min(cap * 3 // 4, 96 << 20))   # 48 MiB on v7x, 96 on v5e/v6e

    w_tile, ch_tile = _pick_tiles(W, CH, x2.dtype.itemsize, block_budget)
    nW = W // w_tile
    nCH = CH // ch_tile

    # ---- phase A: pipelined max / sum reduction over W ----
    x_max2, x_sum2 = pl.pallas_call(
        _reduce_kernel,
        out_shape=(jax.ShapeDtypeStruct((B, 1, CH), jnp.float32),
                   jax.ShapeDtypeStruct((B, 1, CH), jnp.float32)),
        grid=(B, nCH, nW),
        in_specs=[pl.BlockSpec((1, w_tile, ch_tile), lambda b, c, w: (b, w, c))],
        out_specs=(pl.BlockSpec((1, 1, ch_tile), lambda b, c, w: (b, 0, c)),
                   pl.BlockSpec((1, 1, ch_tile), lambda b, c, w: (b, 0, c))),
        compiler_params=pltpu.CompilerParams(
            dimension_semantics=("parallel", "parallel", "arbitrary"),
            vmem_limit_bytes=vmem_limit),
        cost_estimate=pl.CostEstimate(
            flops=2 * B * W * CH, transcendentals=0,
            bytes_accessed=(B * W * CH + 2 * B * CH) * fsize),
    )(x2)

    # ---- phase B: tiny gate kernel in (B, C, H) layout (no transposes) ----
    c1 = jnp.array(
        [conv1_w[0, 0, 0, 0], conv1_w[0, 1, 0, 0], conv1_b[0]], dtype=jnp.float32)
    x_max_bch = x_max2.reshape(B, C, H)                   # free reshape
    x_sum_bch = x_sum2.reshape(B, C, H)
    dw = conv2_w.reshape(C, K).astype(jnp.float32)        # depthwise taps
    gamma2 = gamma.reshape(C, 1).astype(jnp.float32)
    beta2 = beta.reshape(C, 1).astype(jnp.float32)

    gate = pl.pallas_call(
        functools.partial(_gate_kernel, inv_w=1.0 / W, K=K, pad=pad),
        out_shape=jax.ShapeDtypeStruct((B, C, H), jnp.float32),
        grid=(1,),
        in_specs=[
            pl.BlockSpec(memory_space=pltpu.MemorySpace.SMEM),    # conv1 scalars
            pl.BlockSpec((B, C, H), lambda i: (0, 0, 0)),         # x_max
            pl.BlockSpec((B, C, H), lambda i: (0, 0, 0)),         # x_sum
            pl.BlockSpec((C, K), lambda i: (0, 0)),               # depthwise taps
            pl.BlockSpec((C, 1), lambda i: (0, 0)),               # bn gamma
            pl.BlockSpec((C, 1), lambda i: (0, 0)),               # bn beta
        ],
        out_specs=pl.BlockSpec((B, C, H), lambda i: (0, 0, 0)),
        compiler_params=pltpu.CompilerParams(
            dimension_semantics=("arbitrary",)),
        cost_estimate=pl.CostEstimate(
            flops=(2 * K + 12) * B * H * C, transcendentals=2 * B * H * C,
            bytes_accessed=4 * B * H * C * fsize),
    )(c1, x_max_bch, x_sum_bch, dw, gamma2, beta2)

    gate2 = gate.reshape(B, 1, CH)                        # free contiguous reshape

    # ---- phase C: streaming out = x * gate (all-parallel grid) ----
    out2 = pl.pallas_call(
        _mul_kernel,
        out_shape=jax.ShapeDtypeStruct((B, W, CH), x.dtype),
        grid=(B, nCH, nW),
        in_specs=[pl.BlockSpec((1, w_tile, ch_tile), lambda b, c, w: (b, w, c)),
                  pl.BlockSpec((1, 1, ch_tile), lambda b, c, w: (b, 0, c))],
        out_specs=pl.BlockSpec((1, w_tile, ch_tile), lambda b, c, w: (b, w, c)),
        compiler_params=pltpu.CompilerParams(
            dimension_semantics=("parallel", "parallel", "parallel"),
            vmem_limit_bytes=vmem_limit),
        cost_estimate=pl.CostEstimate(
            flops=B * W * CH, transcendentals=0,
            bytes_accessed=(2 * B * W * CH + B * CH) * fsize),
    )(x2, gate2)

    return out2.reshape(B, W, C, H)


def attention_weight_ref(x, conv1_w, conv1_b, conv2_w, gamma, beta, kernel_size=7):
    """Pure-JAX reference mirroring the PyTorch forward (training-mode BN)."""
    B, W, C, H = x.shape
    K = kernel_size
    pad = (K - 1) // 2
    x_max = jnp.max(x, axis=1)
    x_mean = jnp.mean(x, axis=1)
    z = conv1_w[0, 0, 0, 0] * x_max + conv1_w[0, 1, 0, 0] * x_mean + conv1_b[0]
    zp = jnp.pad(z, ((0, 0), (0, 0), (pad, pad)))
    dw = conv2_w.reshape(C, K)
    z2 = jnp.zeros_like(z)
    for k in range(K):
        z2 = z2 + dw[None, :, k:k + 1] * zp[:, :, k:k + H]
    mu = jnp.mean(z2, axis=(0, 2), keepdims=True)
    var = jnp.mean((z2 - mu) ** 2, axis=(0, 2), keepdims=True)
    zn = (z2 - mu) / jnp.sqrt(var + 1e-5)
    zn = zn * gamma[None, :, None] + beta[None, :, None]
    wgt = jax.nn.sigmoid(zn)
    return x * wgt[:, None, :, :]


if __name__ == "__main__":
    key = jax.random.PRNGKey(0)
    kx, k1, k1b, k2, kg, kb = jax.random.split(key, 6)

    B, W, C, H, K = 2, 4, 8, 16, 7   # channel=C=8, kernel_size=7 (CH = 128)
    x = jax.random.normal(kx, (B, W, C, H), dtype=jnp.float32)
    conv1_w = 0.5 * jax.random.normal(k1, (1, 2, 1, 1), dtype=jnp.float32)
    conv1_b = 0.1 * jax.random.normal(k1b, (1,), dtype=jnp.float32)
    conv2_w = 0.3 * jax.random.normal(k2, (C, 1, K), dtype=jnp.float32)
    gamma = 1.0 + 0.1 * jax.random.normal(kg, (C,), dtype=jnp.float32)
    beta = 0.1 * jax.random.normal(kb, (C,), dtype=jnp.float32)

    out = attention_weight(x, conv1_w, conv1_b, conv2_w, gamma, beta, kernel_size=K)
    out = jax.block_until_ready(out)

    ref = attention_weight_ref(x, conv1_w, conv1_b, conv2_w, gamma, beta, K)
    np.testing.assert_allclose(np.asarray(out), np.asarray(ref), rtol=1e-4, atol=1e-4)
    print("KERNEL_OK")
</pallas_src>

<mosaic_0001>
module attributes {stable_mosaic.version = 11 : i64} {
  func.func @_reduce_kernel(%arg0: i32, %arg1: i32, %arg2: i32, %arg3: memref<1x4x128xf32, #tpu.memory_space<vmem>>, %arg4: memref<1x1x128xf32, #tpu.memory_space<vmem>>, %arg5: memref<1x1x128xf32, #tpu.memory_space<vmem>>) attributes {dimension_semantics = [#tpu.dimension_semantics<parallel>, #tpu.dimension_semantics<parallel>, #tpu.dimension_semantics<arbitrary>], iteration_bounds = array<i64: 2, 1, 1>, scalar_prefetch = 0 : i64, scratch_operands = 0 : i64, tpu.core_type = #tpu.core_type<tc>, window_params = [{transform_indices = @transform_0, window_bounds = array<i64: 1, 4, 128>}, {transform_indices = @transform_1, window_bounds = array<i64: 1, 1, 128>}, {transform_indices = @transform_2, window_bounds = array<i64: 1, 1, 128>}]} {
    %c0 = arith.constant 0 : index
    %c0_0 = arith.constant 0 : index
    %c0_1 = arith.constant 0 : index
    %0 = vector.load %arg3[%c0, %c0_0, %c0_1] : memref<1x4x128xf32, #tpu.memory_space<vmem>>, vector<1x4x128xf32>
    %cst = arith.constant dense<0xFF800000> : vector<1x128xf32>
    %1 = vector.multi_reduction <maximumf>, %0, %cst [1] : vector<1x4x128xf32> to vector<1x128xf32>
    %2 = vector.shape_cast %1 : vector<1x128xf32> to vector<1x1x128xf32>
    %cst_2 = arith.constant dense<0.000000e+00> : vector<1x128xf32>
    %3 = vector.multi_reduction <add>, %0, %cst_2 [1] : vector<1x4x128xf32> to vector<1x128xf32>
    %4 = vector.shape_cast %3 : vector<1x128xf32> to vector<1x1x128xf32>
    %c0_i32 = arith.constant 0 : i32
    %5 = arith.cmpi eq, %arg2, %c0_i32 : i32
    %6 = arith.extui %5 : i1 to i32
    %c0_i32_3 = arith.constant 0 : i32
    %7 = arith.cmpi ne, %6, %c0_i32_3 : i32
    scf.if %7 {
      %c0_6 = arith.constant 0 : index
      %c0_7 = arith.constant 0 : index
      %c0_8 = arith.constant 0 : index
      %11 = vector.load %arg4[%c0_6, %c0_7, %c0_8] : memref<1x1x128xf32, #tpu.memory_space<vmem>>, vector<1x1x128xf32>
      tpu.vector_store %arg4[%c0_6, %c0_7, %c0_8], %2 {strides = array<i32>} : memref<1x1x128xf32, #tpu.memory_space<vmem>>, vector<1x1x128xf32>,
      %c0_9 = arith.constant 0 : index
      %c0_10 = arith.constant 0 : index
      %c0_11 = arith.constant 0 : index
      %12 = vector.load %arg5[%c0_9, %c0_10, %c0_11] : memref<1x1x128xf32, #tpu.memory_space<vmem>>, vector<1x1x128xf32>
      tpu.vector_store %arg5[%c0_9, %c0_10, %c0_11], %4 {strides = array<i32>} : memref<1x1x128xf32, #tpu.memory_space<vmem>>, vector<1x1x128xf32>,
    } else {
    }
    %c0_i32_4 = arith.constant 0 : i32
    %8 = arith.cmpi sgt, %arg2, %c0_i32_4 : i32
    %9 = arith.extui %8 : i1 to i32
    %c0_i32_5 = arith.constant 0 : i32
    %10 = arith.cmpi ne, %9, %c0_i32_5 : i32
    scf.if %10 {
      %c0_6 = arith.constant 0 : index
      %c0_7 = arith.constant 0 : index
      %c0_8 = arith.constant 0 : index
      %11 = vector.load %arg4[%c0_6, %c0_7, %c0_8] : memref<1x1x128xf32, #tpu.memory_space<vmem>>, vector<1x1x128xf32>
      %12 = arith.maximumf %11, %2 : vector<1x1x128xf32>
      %c0_9 = arith.constant 0 : index
      %c0_10 = arith.constant 0 : index
      %c0_11 = arith.constant 0 : index
      %13 = vector.load %arg4[%c0_9, %c0_10, %c0_11] : memref<1x1x128xf32, #tpu.memory_space<vmem>>, vector<1x1x128xf32>
      tpu.vector_store %arg4[%c0_9, %c0_10, %c0_11], %12 {strides = array<i32>} : memref<1x1x128xf32, #tpu.memory_space<vmem>>, vector<1x1x128xf32>,
      %c0_12 = arith.constant 0 : index
      %c0_13 = arith.constant 0 : index
      %c0_14 = arith.constant 0 : index
      %14 = vector.load %arg5[%c0_12, %c0_13, %c0_14] : memref<1x1x128xf32, #tpu.memory_space<vmem>>, vector<1x1x128xf32>
      %15 = arith.addf %14, %4 : vector<1x1x128xf32>
      %c0_15 = arith.constant 0 : index
      %c0_16 = arith.constant 0 : index
      %c0_17 = arith.constant 0 : index
      %16 = vector.load %arg5[%c0_15, %c0_16, %c0_17] : memref<1x1x128xf32, #tpu.memory_space<vmem>>, vector<1x1x128xf32>
      tpu.vector_store %arg5[%c0_15, %c0_16, %c0_17], %15 {strides = array<i32>} : memref<1x1x128xf32, #tpu.memory_space<vmem>>, vector<1x1x128xf32>,
    } else {
    }
    return
  }
  func.func @transform_0(%arg0: i32, %arg1: i32, %arg2: i32) -> (i32, i32, i32) {
    %c0_i32 = arith.constant 0 : i32
    return %arg0, %arg2, %arg1 : i32, i32, i32
  }
  func.func @transform_1(%arg0: i32, %arg1: i32, %arg2: i32) -> (i32, i32, i32) {
    %c0_i32 = arith.constant 0 : i32
    %c0_i32_0 = arith.constant 0 : i32
    return %arg0, %c0_i32, %arg1 : i32, i32, i32
  }
  func.func @transform_2(%arg0: i32, %arg1: i32, %arg2: i32) -> (i32, i32, i32) {
    %c0_i32 = arith.constant 0 : i32
    %c0_i32_0 = arith.constant 0 : i32
    return %arg0, %c0_i32, %arg1 : i32, i32, i32
  }
}

</mosaic_0001>

<bundles_post_ra>
// kernel: tpu_custom_call.1
= control target key start
LH: loop header
LB: loop body
LE: loop exit
PB: predicated region body
PF: predicated region fallthrough
CT: control target
= control target key end

     0   :  { %8 = vsyncpa [#allocation3], 0  ;;  %s762_s0 = inlined_call_operand.hbm [shape: f32[2,4,128], index: 0, kind: input, shape index: {}]   ;;  %s763_s1 = inlined_call_operand.hbm [shape: f32[2,1,128], index: 1, kind: output, shape index: {0}]   ;;  %s764_s2 = inlined_call_operand.hbm [shape: f32[2,1,128], index: 2, kind: output, shape index: {1}]  }
   0x1   :  { %10 = vsyncpa [#allocation3 + $0x1], 0 }
   0x2   :  { %11 = vsyncpa [#allocation4], 0 }
   0x3   :  { %13 = vsyncpa [#allocation4 + $0x1], 0 }
   0x4   :  { %14 = vsyncpa [#allocation7], 0 }
   0x5   :  { %16 = vsyncpa [#allocation7 + $0x1], 0  ;;  %s610_s9 = smov 0   ;;  %s612_s10 = smov 0  }
   0x6   :  { %s614_s11 = smov 0   ;;  %s616_s12 = smov 0  }
   0x7   :  { %s618_s13 = smov 0   ;;  %s620_s14 = smov 0  }
   0x8 LB: > { %s372_s15 = sadd.s32 4294967295, %s593_s14   ;;  %s373_s16 = sadd.s32 4294967294, %s593_s14   ;;  %s593_s14 = sphi %s620_s14, %s22_s14   ;;  %s589_s13 = sphi %s618_s13, %s773_s13   ;;  %s585_s12 = sphi %s616_s12, %s772_s12   ;;  %s581_s11 = sphi %s614_s11, %s771_s11   ;;  %s577_s10 = sphi %s612_s10, %s770_s10   ;;  %s573_s9 = sphi %s610_s9, %s769_s9  }
   0x9   : > { %s41_s17 = sadd.s32 1, %s589_s13  ;;  %s52_s18 = sadd.s32 1, %s581_s11 }
   0xa   : > { %p43_p0 = scmp.ge.s32.totalorder %s41_s17, 2  ;;  %p59_p1 = scmp.ne.s32.totalorder %s581_s11, %s577_s10 }
   0xb   : > { %p60_p2 = scmp.eq.s32.totalorder %s593_s14, 0  ;;  %p65_p3 = scmp.ne.s32.totalorder %s577_s10, %s573_s9 }
   0xc   : > { %s775_s17 = smov (%p43_p0, %s41_s17), 0  ;;  %p66_p5 = scmp.eq.s32.totalorder %s372_s15, 0 }
   0xd   : > { %p651_p4 = por %p60_p2, %p59_p1  ;;  %s45_s20 = ssub.s32 %s589_s13, %s775_s17 }
   0xe   : > { %p91_p6 = scmp.eq.s32.totalorder %s372_s15, 1  ;;  %p50_p7 = scmp.eq.s32.totalorder %s45_s20, 0 }
   0xf   : > { %p657_p8 = por %p66_p5, %p65_p3  ;;  %p97_p10 = scmp.eq.s32.totalorder %s373_s16, 1 }
  0x10   : > { %p661_p9 = por %p91_p6, %p59_p1  ;;  %p375_p12 = scmp.ge.s32.totalorder %s593_s14, 2 }
  0x11   : > { %s666_s23 = scalar_select %p50_p7, %s581_s11, %s52_s18  }
  0x12   : > { %p668_p11 = por %p97_p10, %p65_p3  ;;  %p399_p13 = scmp.lt.s32.totalorder %s593_s14, 2 }
  0x13   : > { %s145_s25 = sand.u32 1, %s581_s11   ;;  %s377_s27 = sshll.u32 %s589_s13, 2 }
  0x14   : > { %s376_s26 = sshll.u32 %s145_s25, 2  ;;  %s155_s30 = scalar_lea.hbm %s762_s0, %s377_s27 }
  0x15   : > { %s149_s3 = scalar_lea.vmem [#allocation2], %s376_s26  ;;  %s157_s5 = sshll.u32 %s155_s30, 4  ;;  %s158_s5 = int_to_ptr.hbm [resolvable:$true] %s157_s5 }
  0x16   : > { %s159_s4 = sshll.u32 %s149_s3, 4  ;;  %p389_p0 = pnand %p399_p13, %p651_p4  ;;  %s160_s4 = int_to_ptr.vmem [resolvable:$true] %s159_s4 }
  0x17   : > { %p378_p1 = scmp.ge.s32.totalorder %s593_s14, 1  ;;  %p164_p2 = scmp.lt.s32.totalorder %s593_s14, 3 }
  0x18   : > { %s146_s6 = scalar_lea.sflag [#allocation3], %s145_s25 }
  0x19   : > { %391 = dma.hbm_to_vmem [thread:$0]  (!%p389_p0), %s158_s5, 64, %s160_s4, %s146_s6  }
  0x1a   : > { %p165_p3 = pnand %p378_p1, %p164_p2 }
  0x1b   : > { %s684_s7 = sand.u32 (!%p165_p3), 1, %s577_s10  }
  0x1c   : > { %168 = sbr.rel (%p165_p3) target bundleno = 64 (0x40), region = 24  ;;  %s379_s8 = sshll.u32 (!%p165_p3), %s684_s7, 2 }
  0x1d   : > { %s171_s15 = scalar_lea.sflag (!%p165_p3), [#allocation3], %s684_s7  ;;  %s174_s16 = scalar_lea.vmem (!%p165_p3), [#allocation2], %s379_s8 }
  0x21   : > { %560 = dma.done.wait (%p657_p8), %s171_s15, 64  }
  0x22   : > { %562 = vsyncadd (%p657_p8), %s171_s15, 4294967232  ;;  %vm200_vm0 = vcmask 1043456   ;;  %v199_v0 = vld [vmem:[%s174_s16] sm:$0xf]  ;;  %s245_s20 = scalar_lea.hbm %s763_s1, %s585_s12  ;;  %s259_s26 = scalar_lea.hbm %s764_s2, %s585_s12 }
  0x23   : > { %v201_v1 = vsel %vm200_vm0, %v199_v0, -inf  ;;  %v208_v2 = vsel %vm200_vm0, %v199_v0, 0.0  ;;  %s192_s27 = scalar_lea.vmem [#allocation5], %s684_s7  ;;  %s198_s29 = scalar_lea.vmem [#allocation6], %s684_s7 }
  0x24   : > { %v202_v3 = vrot.slane %v201_v1, 4  ;;  %v209_v4 = vrot.slane %v208_v2, 4  ;;  %s701_s28 = sshll.u32 %s192_s27, 4  ;;  %s704_s30 = sshll.u32 %s198_s29, 4  ;;  %s248_s28 = int_to_ptr.vmem [resolvable:$true] %s701_s28  ;;  %s262_s30 = int_to_ptr.vmem [resolvable:$true] %s704_s30 }
  0x25   : > { %s249_s3 = sshll.u32 %s245_s20, 4  ;;  %s706_s4 = sshll.u32 %s259_s26, 4  ;;  %s250_s3 = int_to_ptr.hbm [resolvable:$true] %s249_s3  ;;  %s264_s4 = int_to_ptr.hbm [resolvable:$true] %s706_s4 }
  0x26   : > { %v203_v5 = vmax.f32 %v201_v1, %v202_v3  ;;  %v210_v6 = vadd.f32 %v209_v4, %v208_v2  ;;  %s232_s12 = scalar_lea.sflag [#allocation4], %s684_s7  ;;  %s493_s5 = sshra.s32 %s250_s3, 4  ;;  %s494_s5 = int_to_ptr.hbm [resolvable:$true] %s493_s5 }
  0x27   : > { %s495_s6 = scalar_lea.hbm %s494_s5, 1  ;;  %s499_s16 = scalar_lea.hbm %s763_s1, 2 }
  0x28   : > { %v204_v7 = vrot.slane %v203_v5, 2  ;;  %v211_v8 = vrot.slane %v210_v6, 2  ;;  %p496_p4 = scmp.ne.s32.totalorder %s494_s5, %s495_s6  ;;  %p500_p7 = scmp.lt.s32.totalorder %s494_s5, %s763_s1 }
  0x29   : > { %p501_p8 = scmp.lt.s32.totalorder %s499_s16, %s495_s6 }
  0x2a   : > { %v205_v9 = vmax.f32 %v203_v5, %v204_v7  ;;  %v212_v10 = vadd.f32 %v211_v8, %v210_v6  ;;  %p497_p5 = pnand %p496_p4, %p661_p9 }
  0x2b   : > { %p502_p10 = por %p501_p8, %p500_p7 }
  0x2c   : > { %v206_v11 = vrot.slane %v205_v9, 1  ;;  %v213_v12 = vrot.slane %v212_v10, 1  ;;  %p498_p6 = pneg %p497_p5 }
  0x2e   : > { %v207_v13 = vmax.f32 %v205_v9, %v206_v11  ;;  %v214_v14 = vadd.f32 %v213_v12, %v212_v10  ;;  %p503_p13 = pnand %p502_p10, %p498_p6 }
  0x30   : > { %219 = vst [vmem:[%s192_s27] sm:$0x1] %v207_v13 }
  0x31   : > { %220 = vst [vmem:[%s198_s29] sm:$0x1] %v214_v14 }
  0x32   : > { %506 = shalt.err (!%p503_p13)
}
  0x33   : > { %384 = dma.vmem_to_hbm [thread:$0]  (%p661_p9), %s248_s28, 16, %s250_s3, %s232_s12  }
  0x34   : > { %s236_s20 = scalar_lea.sflag [#allocation7], %s684_s7  ;;  %s521_s21 = sshra.s32 %s264_s4, 4  ;;  %s522_s21 = int_to_ptr.hbm [resolvable:$true] %s521_s21 }
  0x35   : > { %s523_s25 = scalar_lea.hbm %s522_s21, 1  ;;  %s527_s29 = scalar_lea.hbm %s764_s2, 2 }
  0x36   : > { %p524_p0 = scmp.ne.s32.totalorder %s522_s21, %s523_s25  ;;  %p528_p3 = scmp.lt.s32.totalorder %s522_s21, %s764_s2 }
  0x37   : > { %p529_p4 = scmp.lt.s32.totalorder %s527_s29, %s523_s25 }
  0x38   : > { %p525_p1 = pnand %p524_p0, %p661_p9 }
  0x39   : > { %p530_p5 = por %p529_p4, %p528_p3 }
  0x3a   : > { %p526_p2 = pneg %p525_p1 }
  0x3c   : > { %p531_p6 = pnand %p530_p5, %p526_p2 }
  0x3e   : > { %534 = shalt.err (!%p531_p6)
}
  0x3f   : > { %385 = dma.vmem_to_hbm [thread:$0]  (%p661_p9), %s262_s30, 16, %s264_s4, %s236_s20  }
  0x40 PF: > { %s275_s7 = sand.u32 1, %s573_s9   ;;  %p393_p7 = pnand %p375_p12, %p668_p11 }
  0x41   : > { %s276_s28 = scalar_lea.sflag [#allocation4], %s275_s7 }
  0x42   : > { %p394_p8 = pneg %p393_p7 }
  0x44   : > { %564 = dma.done.wait (%p394_p8), %s276_s28, 16  }
  0x45   : > { %566 = vsyncadd (%p394_p8), %s276_s28, 4294967280  ;;  %s285_s3 = scalar_lea.sflag [#allocation7], %s275_s7 }
  0x46   : > { %568 = dma.done.wait (%p394_p8), %s285_s3, 16  }
  0x47   : > { %570 = vsyncadd (%p394_p8), %s285_s3, 4294967280  ;;  %s22_s14 = sadd.s32 1, %s593_s14   ;;  %s769_s9 = smov %s577_s10 }
  0x48   : > { %p19_p10 = scmp.ge.s32.totalorder %s22_s14, 4   ;;  %s770_s10 = smov %s581_s11 }
  0x49   : > { %s771_s11 = smov %s666_s23  ;;  %s772_s12 = smov %s589_s13 }
  0x4a   : > { %s773_s13 = smov %s775_s17  ;;  %21 = sbr.rel (!%p19_p10) target bundleno = 8 (0x8), region = 94 }
  0x4f   :  { %290 = vsyncpa [#allocation3], 1 }
  0x50   :  { %292 = vsyncpa [#allocation3 + $0x1], 1 }
  0x51   :  { %293 = vsyncpa [#allocation4], 1 }
  0x52   :  { %295 = vsyncpa [#allocation4 + $0x1], 1 }
  0x53   :  { %296 = vsyncpa [#allocation7], 1 }
  0x54   :  { %298 = vsyncpa [#allocation7 + $0x1], 1 }

</bundles_post_ra>
